<compile_context>
chip_gen: v7x
topology: tpu7x:2x2x1
jax: 0.10.0
libtpu: 0.0.40
codegen_flags: <defaults>
</compile_context>

<pallas_src>
import functools

import jax
import jax.numpy as jnp
from jax import lax
from jax.experimental import pallas as pl
from jax.experimental.pallas import tpu as pltpu


# ---------------------------------------------------------------------------
# Pallas kernel: one lane-dense scoring tile
#   scores[:, e*TE:(e+1)*TE] = h (B_pad, de) @ ent_t_tile (de, TE)
# ---------------------------------------------------------------------------
def spucker_score_kernel(h_ref, ent_t_ref, o_ref):
    # HBM-bound on the entity-table stream; query side stays in f32 and the
    # streamed (possibly bf16) tile is upcast in-register (free on the VPU).
    o_ref[...] = jnp.dot(
        h_ref[...],
        ent_t_ref[...].astype(jnp.float32),
        preferred_element_type=jnp.float32,
    )


# ---------------------------------------------------------------------------
# One-time parameter preparation (NOT in the per-call path).
# ---------------------------------------------------------------------------
def _tpu_vmem_budget_bytes(default_capacity=64 << 20):
    """Generation-aware VMEM budget (v7x: 64 MiB physical, v5e/v6e: 128 MiB)."""
    cap = default_capacity
    try:
        info = pltpu.get_tpu_info()
        cap_attr = getattr(info, "vmem_capacity_bytes", None)
        if cap_attr:
            cap = int(cap_attr)
    except Exception:
        pass
    return int(min((cap * 3) // 4, 96 << 20))


def _pick_entity_tile(E, de, B_pad, table_itemsize, budget_bytes):
    """Lane-dense entity tile (multiple of 128) that targets the VMEM budget,
    while keeping >= 2 grid tiles so the "parallel" E axis shards across
    TensorCores (megacore on v7x)."""
    # Per output lane: double-buffered streamed table column + double-buffered
    # f32 score column + one f32 in-kernel upcast of the table column.
    per_lane = 2 * (de * table_itemsize + B_pad * 4) + de * 4
    te = (budget_bytes // per_lane) // 128 * 128
    te = int(max(128, min(te, 32768)))
    e_pad128 = -(-E // 128) * 128
    if e_pad128 >= 256:
        te = min(te, max(128, (e_pad128 // 2) // 128 * 128))
    return min(te, e_pad128)


def prepare_scoring_table(sub_w, table_dtype=jnp.bfloat16, te=None, b_hint=8):
    """Store the entity table transposed (de, E_pad), padded to a multiple of
    the entity tile, in the streamed dtype.  Done once at param-prep time.

    Returns (ent_t, te, vmem_limit_bytes)."""
    E, de = sub_w.shape
    itemsize = jnp.dtype(table_dtype).itemsize
    budget = _tpu_vmem_budget_bytes()
    b_pad = max(8, -(-int(b_hint) // 8) * 8)
    if te is None:
        te = _pick_entity_tile(E, de, b_pad, itemsize, budget)
    te = int(te)
    assert te % 128 == 0, "entity tile must be lane-dense (multiple of 128)"
    E_pad = -(-E // te) * te
    ent_t = jnp.asarray(sub_w).T.astype(table_dtype)           # (de, E)
    if E_pad != E:
        ent_t = jnp.pad(ent_t, ((0, 0), (0, E_pad - E)))
    return ent_t, te, budget


# ---------------------------------------------------------------------------
# Forward pass (per-call path).
# ---------------------------------------------------------------------------
@functools.partial(jax.jit, static_argnames=("te", "vmem_limit_bytes", "eps"))
def spucker_forward(s_idx, r_idx, params, ent_t, *, te, vmem_limit_bytes,
                    eps=1e-5):
    sub_w = params["sub_emb"]        # (E, de)  master f32 table (gathers only)
    rel_w = params["rel_emb"]        # (R, dr)
    W = params["W"]                  # (dr, de, de)

    E, de = sub_w.shape
    dr = rel_w.shape[1]
    B = s_idx.shape[0]
    de_t, E_pad = ent_t.shape
    assert de_t == de and E_pad % te == 0

    # ---- tiny glue (plain JAX, hoisted out of the bandwidth-bound loop) ----
    s_emb = jnp.take(sub_w, s_idx, axis=0).astype(jnp.float32)   # (B, de)
    r_emb = jnp.take(rel_w, r_idx, axis=0).astype(jnp.float32)   # (B, dr)

    # BatchNorm1d (eval mode) folded into elementwise scale/bias.
    # TODO(synk): sub_drop / hidden_drop1 / hidden_drop2 are identity in eval mode.
    bss = params["bn_sub_gamma"] * lax.rsqrt(params["bn_sub_var"] + eps)
    bsb = params["bn_sub_beta"] - params["bn_sub_mean"] * bss
    bhs = params["bn_hid_gamma"] * lax.rsqrt(params["bn_hid_var"] + eps)
    bhb = params["bn_hid_beta"] - params["bn_hid_mean"] * bhs

    s_bn = s_emb * bss[None, :] + bsb[None, :]                   # bn_sub folded

    # h[b,j] = sum_{k,i} r[b,k] * s_bn[b,i] * W[k,i,j]  (one tiny matmul, once)
    m = (r_emb[:, :, None] * s_bn[:, None, :]).reshape(B, dr * de)
    h = m @ W.reshape(dr * de, de).astype(jnp.float32)
    h = h * bhs[None, :] + bhb[None, :]                          # bn_hidden folded
    h = h.astype(jnp.float32)

    # Pad B to a sublane multiple so the (B, TE) score tiles store unmasked.
    B_pad = -(-B // 8) * 8
    if B_pad != B:
        h = jnp.pad(h, ((0, B_pad - B), (0, 0)))

    n_tiles = E_pad // te
    itemsize = jnp.dtype(ent_t.dtype).itemsize

    cost = pl.CostEstimate(
        flops=2 * B_pad * de * E_pad,
        transcendentals=0,
        bytes_accessed=int(E_pad * de * itemsize      # streamed entity table
                           + B_pad * de * 4           # resident h
                           + B_pad * E_pad * 4))      # score writeback

    out = pl.pallas_call(
        spucker_score_kernel,
        out_shape=jax.ShapeDtypeStruct((B_pad, E_pad), jnp.float32),
        grid=(n_tiles,),
        in_specs=[
            pl.BlockSpec((B_pad, de), lambda e: (0, 0)),   # h (VMEM-resident)
            pl.BlockSpec((de, te), lambda e: (0, e)),      # lane-dense table tile
        ],
        out_specs=pl.BlockSpec((B_pad, te), lambda e: (0, e)),
        compiler_params=pltpu.CompilerParams(
            dimension_semantics=("parallel",),
            vmem_limit_bytes=int(vmem_limit_bytes)),
        cost_estimate=cost,
    )(h, ent_t)

    # TODO(synk): for large production B, emit bf16 scores or fuse the downstream
    # reduction/top-k so the (B, E) f32 score matrix never hits HBM.
    return out[:B, :E]


# ---------------------------------------------------------------------------
# Pure-JAX reference mirroring the PyTorch forward (eval mode).
# ---------------------------------------------------------------------------
def ref_forward(s_idx, r_idx, params, eps=1e-5):
    sub_w = params["sub_emb"]
    rel_w = params["rel_emb"]
    W = params["W"]
    dr = rel_w.shape[1]
    de = sub_w.shape[1]

    r = rel_w[r_idx]
    x = (r @ W.reshape(dr, -1)).reshape(-1, de, de)
    s = sub_w[s_idx]
    s = (s - params["bn_sub_mean"]) / jnp.sqrt(params["bn_sub_var"] + eps) \
        * params["bn_sub_gamma"] + params["bn_sub_beta"]
    h = jnp.einsum("bi,bij->bj", s, x)
    h = (h - params["bn_hid_mean"]) / jnp.sqrt(params["bn_hid_var"] + eps) \
        * params["bn_hid_gamma"] + params["bn_hid_beta"]
    return h @ sub_w.T


if __name__ == "__main__":
    key = jax.random.PRNGKey(0)
    num_entities = 256
    num_relations = 16
    ent_emb_dim = 32
    rel_emb_dim = 16
    B = 8

    k1, k2, k3, k4, k5 = jax.random.split(key, 5)

    # Deterministic parameter init (shapes from SpuckerModel.__init__).
    std_sub = (2.0 / (num_entities + ent_emb_dim)) ** 0.5    # xavier_normal_
    std_rel = (2.0 / (num_relations + rel_emb_dim)) ** 0.5   # xavier_normal_
    params = {
        "sub_emb": std_sub * jax.random.normal(
            k1, (num_entities, ent_emb_dim), jnp.float32),
        "rel_emb": std_rel * jax.random.normal(
            k2, (num_relations, rel_emb_dim), jnp.float32),
        "W": jax.random.uniform(
            k3, (rel_emb_dim, ent_emb_dim, ent_emb_dim),
            jnp.float32, -1.0, 1.0),
        # BatchNorm1d default init (gamma=1, beta=0, running stats 0/1).
        "bn_sub_gamma": jnp.ones((ent_emb_dim,), jnp.float32),
        "bn_sub_beta": jnp.zeros((ent_emb_dim,), jnp.float32),
        "bn_sub_mean": jnp.zeros((ent_emb_dim,), jnp.float32),
        "bn_sub_var": jnp.ones((ent_emb_dim,), jnp.float32),
        "bn_hid_gamma": jnp.ones((ent_emb_dim,), jnp.float32),
        "bn_hid_beta": jnp.zeros((ent_emb_dim,), jnp.float32),
        "bn_hid_mean": jnp.zeros((ent_emb_dim,), jnp.float32),
        "bn_hid_var": jnp.ones((ent_emb_dim,), jnp.float32),
    }

    s_idx = jax.random.randint(k4, (B,), 0, num_entities)
    r_idx = jax.random.randint(k5, (B,), 0, num_relations)

    expected = ref_forward(s_idx, r_idx, params)

    # 1) f32 table, forced te=128 -> 2 entity tiles (exercises the grid): tight check.
    ent_f32, te_f32, vmem_f32 = prepare_scoring_table(
        params["sub_emb"], table_dtype=jnp.float32, te=128, b_hint=B)
    out_f32 = spucker_forward(s_idx, r_idx, params, ent_f32,
                              te=te_f32, vmem_limit_bytes=vmem_f32)
    out_f32 = jax.block_until_ready(out_f32)
    assert out_f32.shape == (B, num_entities), out_f32.shape
    assert jnp.allclose(out_f32, expected, atol=1e-4, rtol=1e-4), \
        float(jnp.max(jnp.abs(out_f32 - expected)))

    # 2) bf16 streamed-table fast path, auto tile / VMEM budget: loose check.
    ent_bf16, te_bf16, vmem_bf16 = prepare_scoring_table(
        params["sub_emb"], table_dtype=jnp.bfloat16, b_hint=B)
    out_bf16 = spucker_forward(s_idx, r_idx, params, ent_bf16,
                               te=te_bf16, vmem_limit_bytes=vmem_bf16)
    out_bf16 = jax.block_until_ready(out_bf16)
    assert out_bf16.shape == (B, num_entities), out_bf16.shape
    assert jnp.allclose(out_bf16, expected, atol=1e-2, rtol=1e-2), \
        float(jnp.max(jnp.abs(out_bf16 - expected)))

    print("KERNEL_OK")
</pallas_src>

<mosaic_0001>
module attributes {stable_mosaic.version = 11 : i64} {
  func.func @spucker_score_kernel(%arg0: i32, %arg1: memref<8x32xf32, #tpu.memory_space<vmem>>, %arg2: memref<32x128xf32, #tpu.memory_space<vmem>>, %arg3: memref<8x128xf32, #tpu.memory_space<vmem>>) attributes {dimension_semantics = [#tpu.dimension_semantics<parallel>], iteration_bounds = array<i64: 2>, scalar_prefetch = 0 : i64, scratch_operands = 0 : i64, tpu.core_type = #tpu.core_type<tc>, window_params = [{pipeline_mode = #tpu.pipeline_mode<synchronous>, transform_indices = @transform_0, window_bounds = array<i64: 8, 32>}, {transform_indices = @transform_1, window_bounds = array<i64: 32, 128>}, {transform_indices = @transform_2, window_bounds = array<i64: 8, 128>}]} {
    %c0 = arith.constant 0 : index
    %c0_0 = arith.constant 0 : index
    %0 = vector.load %arg1[%c0, %c0_0] : memref<8x32xf32, #tpu.memory_space<vmem>>, vector<8x32xf32>
    %c0_1 = arith.constant 0 : index
    %c0_2 = arith.constant 0 : index
    %1 = vector.load %arg2[%c0_1, %c0_2] : memref<32x128xf32, #tpu.memory_space<vmem>>, vector<32x128xf32>
    %cst = arith.constant dense<0.000000e+00> : vector<8x128xf32>
    %2 = tpu.matmul %0, %1, %cst {dimension_numbers = #tpu.dot_dimension_numbers<[1], [0], [0], [1], [0, 0, 1, 1], [], []>} : vector<8x32xf32>, vector<32x128xf32>, vector<8x128xf32> -> vector<8x128xf32>
    %c0_3 = arith.constant 0 : index
    %c0_4 = arith.constant 0 : index
    %3 = vector.load %arg3[%c0_3, %c0_4] : memref<8x128xf32, #tpu.memory_space<vmem>>, vector<8x128xf32>
    tpu.vector_store %arg3[%c0_3, %c0_4], %2 {strides = array<i32>} : memref<8x128xf32, #tpu.memory_space<vmem>>, vector<8x128xf32>,
    return
  }
  func.func @transform_0(%arg0: i32) -> (i32, i32) {
    %c0_i32 = arith.constant 0 : i32
    %c0_i32_0 = arith.constant 0 : i32
    %c0_i32_1 = arith.constant 0 : i32
    return %c0_i32, %c0_i32_0 : i32, i32
  }
  func.func @transform_1(%arg0: i32) -> (i32, i32) {
    %c0_i32 = arith.constant 0 : i32
    %c0_i32_0 = arith.constant 0 : i32
    return %c0_i32, %arg0 : i32, i32
  }
  func.func @transform_2(%arg0: i32) -> (i32, i32) {
    %c0_i32 = arith.constant 0 : i32
    %c0_i32_0 = arith.constant 0 : i32
    return %c0_i32, %arg0 : i32, i32
  }
}

</mosaic_0001>

<bundles_post_ra>
// kernel: spucker_forward.1
= control target key start
LH: loop header
LB: loop body
LE: loop exit
PB: predicated region body
PF: predicated region fallthrough
CT: control target
= control target key end

     0   :  { %7 = vsyncpa [#allocation4], 0  ;;  %s620_s0 = inlined_call_operand.vmem [shape: f32[8,32], index: 0, kind: input, shape index: {}]   ;;  %s621_s1 = inlined_call_operand.vmem [shape: f32[32,256], index: 1, kind: input, shape index: {}]   ;;  %s622_s2 = inlined_call_operand.hbm [shape: f32[8,256], index: 2, kind: output, shape index: {}]  }
   0x1   :  { %9 = vsyncpa [#allocation4 + $0x1], 0  ;;  %s507_s9 = smov 0   ;;  %s509_s10 = smov 0  }
   0x2   :  { %s511_s11 = smov 0   ;;  %s513_s12 = smov 0  }
   0x3 LB: > { %s346_s13 = sadd.s32 4294967295, %s486_s12   ;;  %s347_s14 = sadd.s32 4294967294, %s486_s12   ;;  %s486_s12 = sphi %s513_s12, %s628_s12   ;;  %s482_s11 = sphi %s511_s11, %s627_s11   ;;  %s478_s10 = sphi %s509_s10, %s626_s10   ;;  %s474_s9 = sphi %s507_s9, %s625_s9  }
   0x4   : > { %s530_s15 = sadd.s32 1, %s486_s12   ;;  %s43_s16 = sadd.s32 1, %s482_s11 }
   0x5   : > { %s40_s17 = ssub.s32 %s486_s12, %s530_s15  ;;  %p50_p0 = scmp.ne.s32.totalorder %s482_s11, %s478_s10 }
   0x6   : > { %p41_p1 = scmp.eq.s32.totalorder %s40_s17, 0  ;;  %p51_p2 = scmp.eq.s32.totalorder %s486_s12, 0 }
   0x7   : > { %p80_p3 = scmp.eq.s32.totalorder %s346_s13, 1  ;;  %p85_p4 = scmp.ne.s32.totalorder %s478_s10, %s474_s9 }
   0x8   : > { %s543_s18 = scalar_select %p41_p1, %s482_s11, %s43_s16  }
   0x9   : > { %p52_p5 = por %p51_p2, %p50_p0  ;;  %p545_p6 = por %p80_p3, %p50_p0 }
   0xa   : > { %p86_p7 = scmp.eq.s32.totalorder %s347_s14, 1  ;;  %p349_p9 = scmp.ge.s32.totalorder %s486_s12, 2 }
   0xc   : > { %p549_p8 = por %p86_p7, %p85_p4  ;;  %105 = sbr.rel (%p349_p9) target bundleno = 26 (0x1a), region = 20 }
  0x13   : > { %108 = sbr.rel (!%p52_p5) target bundleno = 26 (0x1a), region = 24  ;;  %s110_s21 = sand.u32 (%p52_p5), 1, %s482_s11  }
  0x14   : > { %s351_s22 = sshll.u32 (%p52_p5), %s486_s12, 3  ;;  %s350_s23 = sshll.u32 (%p52_p5), %s110_s21, 5 }
  0x15   : > { %s114_s26 = scalar_lea.vmem (%p52_p5), %s621_s1, %s351_s22  ;;  %s112_s27 = scalar_lea.vmem (%p52_p5), [#allocation2], %s350_s23 }
  0x16   : > { %v148_v0 = vld [vmem:[%s114_s26] sm:$0xff] (%p52_p5)  ;;  %v150_v1 = vld [vmem:[%s114_s26 + $0x10] sm:$0xff] (%p52_p5) }
  0x17   : > { %v152_v2 = vld [vmem:[%s114_s26 + $0x20] sm:$0xff] (%p52_p5)  ;;  %149 = vst [vmem:[%s112_s27] sm:$0xff] (%p52_p5), %v148_v0  ;;  %151 = vst [vmem:[%s112_s27 + $0x8] sm:$0xff] (%p52_p5), %v150_v1  ;;  %v154_v3 = vld [vmem:[%s114_s26 + $0x30] sm:$0xff] (%p52_p5) }
  0x18   : > { %153 = vst [vmem:[%s112_s27 + $0x10] sm:$0xff] (%p52_p5), %v152_v2  ;;  %155 = vst [vmem:[%s112_s27 + $0x18] sm:$0xff] (%p52_p5), %v154_v3 }
  0x1a PF: > { %p352_p10 = scmp.ge.s32.totalorder %s486_s12, 1  ;;  %p160_p11 = scmp.lt.s32.totalorder %s486_s12, 3 }
  0x1c   : > { %p161_p12 = pnand %p352_p10, %p160_p11 }
  0x1d   : > { %s564_s28 = sand.u32 (!%p161_p12), 1, %s478_s10   ;;  %v488_v4 = vmov (!%p161_p12), 0.0|0.0   ;;  %vm489_vm0 = vmmov (!%p161_p12), 0   ;;  %v490_v5 = vmov (!%p161_p12), 0.0   ;;  %v188_v12 = vld [vmem:[%s620_s0] sm:$0xff] (!%p161_p12)  ;;  %vm193_vm1 = vcmask (!%p161_p12), 261120  }
  0x1e   : > { %164 = sbr.rel (%p161_p12) target bundleno = 268 (0x10c), region = 62  ;;  %376 = vmatprep.subr.bf16.mxu0 (!%p161_p12), %v488_v4  ;;  %s353_s29 = sshll.u32 (!%p161_p12), %s564_s28, 5  ;;  %373 = vmatprep.mubr.msk.f32.mxu0 (!%p161_p12), %vm489_vm0, %v490_v5 }
  0x1f   : > { %s169_s30 = scalar_lea.vmem (!%p161_p12), [#allocation2], %s353_s29  ;;  %s354_s5 = sshll.u32 (!%p161_p12), %s564_s28, 3 }
  0x20   : > { %v189_v6 = vld [vmem:[%s169_s30] sm:$0xff] (!%p161_p12)  ;;  %v190_v7 = vld [vmem:[%s169_s30 + $0x8] sm:$0xff] (!%p161_p12)  ;;  %v191_v8 = vld [vmem:[%s169_s30 + $0x10] sm:$0xff] (!%p161_p12)  ;;  %s187_s6 = scalar_lea.vmem (!%p161_p12), [#allocation3], %s354_s5  ;;  %s357_s8 = sshll.u32 (!%p161_p12), %s346_s13, 7 }
  0x21   : > { %v377_v9 = vpack.c.bf16 (!%p161_p12), %v190_v7, %v189_v6  ;;  %v192_v10 = vld [vmem:[%s169_s30 + $0x18] sm:$0xff] (!%p161_p12)  ;;  %s282_s7 = sshll.u32 (!%p161_p12), %s187_s6, 4  ;;  %s578_s17 = scalar_lea.hbm (!%p161_p12), %s622_s2, %s357_s8  ;;  %s573_s7 = int_to_ptr.vmem [resolvable:$true] %s282_s7 }
  0x22   : > { %v380_v11 = vpack.c.bf16 (!%p161_p12), %v192_v10, %v191_v8  ;;  %s269_s21 = scalar_lea.sflag (!%p161_p12), [#allocation4], %s564_s28  ;;  %s424_s22 = scalar_lea.vmem (!%p161_p12), %s573_s7, 128 }
  0x23   : > { %378 = vmatpush3.bf16.msra.mxu0 (!%p161_p12), %v377_v9  ;;  %p425_p13 = scmp.ne.s32.totalorder (!%p161_p12), %s573_s7, %s424_s22  ;;  %s491_s13 = smov (!%p161_p12), [#allocation3]  }
  0x24   : > { %379 = vmatprep.subr.bf16.mxu0 (!%p161_p12), %v488_v4  ;;  %s428_s23 = sshll.u32 (!%p161_p12), %s491_s13, 4  ;;  %s429_s23 = int_to_ptr.vmem [resolvable:$false] %s428_s23 }
  0x25   : > { %p426_p0 = pnand %p425_p13, %p545_p6  ;;  %s430_s24 = scalar_lea.vmem %s429_s23, 256 }
  0x26   : > { %p431_p2 = scmp.lt.s32.totalorder %s573_s7, %s429_s23  ;;  %p432_p3 = scmp.lt.s32.totalorder %s430_s24, %s424_s22 }
  0x27   : > { %381 = vmatpush3.bf16.msra.mxu0 %v380_v11  ;;  %p427_p1 = pneg %p426_p0 }
  0x28   : > { %p433_p4 = por %p432_p3, %p431_p2 }
  0x2a   : > { %374 = vmatmul.mubr.msk.f32.vlgmr.msra.gmra.mrb[0].mxu0 %vm193_vm1, %v188_v12  ;;  %p434_p5 = pnand %p433_p4, %p427_p1 }
  0xfd   : > { %v263_v13 = vpop.f32.mrb[0].mxu0 }
  0xfe   : > { %267 = vst [vmem:[%s187_s6] sm:$0xff] %v263_v13  ;;  %v375_v14 = vpop.f32.mrb[1].mxu0 }
  0xff   : > { %437 = shalt.err (!%p434_p5)
}
 0x100   : > { %s438_s25 = scalar_lea.hbm %s578_s17, 128  ;;  %s442_s28 = scalar_lea.hbm %s622_s2, 256 }
 0x101   : > { %p439_p7 = scmp.ne.s32.totalorder %s578_s17, %s438_s25  ;;  %p443_p12 = scmp.lt.u32.totalorder %s578_s17, %s622_s2 }
 0x102   : > { %p444_p13 = scmp.lt.u32.totalorder %s442_s28, %s438_s25  ;;  %p446_p1 = scmp.lt.u32.totalorder %s438_s25, %s578_s17 }
 0x103   : > { %p440_p10 = pnand %p439_p7, %p545_p6 }
 0x104   : > { %p445_p0 = por %p444_p13, %p443_p12 }
 0x105   : > { %p441_p11 = pneg %p440_p10 }
 0x106   : > { %p447_p2 = por %p446_p1, %p445_p0 }
 0x108   : > { %p448_p3 = pnand %p447_p2, %p441_p11 }
 0x10a   : > { %451 = shalt.err (!%p448_p3)
}
 0x10b   : > { %382 = dma.vmem_to_hbm [thread:$0]  (%p545_p6), %s573_s7, 128, %s578_s17, %s269_s21  }
 0x10c PF: > { %s294_s3 = sand.u32 1, %s474_s9   ;;  %p385_p4 = pnand %p349_p9, %p549_p8 }
 0x10d   : > { %s295_s4 = scalar_lea.sflag [#allocation4], %s294_s3 }
 0x10e   : > { %469 = dma.done.wait (!%p385_p4), %s295_s4, 128  }
 0x10f   : > { %471 = vsyncadd (!%p385_p4), %s295_s4, 4294967168  ;;  %p12_p5 = scmp.ge.s32.totalorder %s530_s15, 4   ;;  %s625_s9 = smov %s478_s10 }
 0x110   : > { %s626_s10 = smov %s482_s11  ;;  %s627_s11 = smov %s543_s18 }
 0x111   : > { %s628_s12 = smov %s530_s15  ;;  %14 = sbr.rel (!%p12_p5) target bundleno = 3 (0x3), region = 106 }
 0x118   :  { %300 = vsyncpa [#allocation4], 1 }
 0x119   :  { %302 = vsyncpa [#allocation4 + $0x1], 1 }

</bundles_post_ra>
